<compile_context>
chip_gen: v6e
topology: v6e:2x2x1
jax: 0.10.0
libtpu: 0.0.40
codegen_flags: <defaults>
</compile_context>

<pallas_src>
import jax
import jax.numpy as jnp
from jax.experimental import pallas as pl
from jax.experimental.pallas import tpu as pltpu

N = 2                    # state dim (module default n=2)
HID = 64                 # hidden width of both MLPs
M = N * (N + 1) // 2     # = 3, lower-triangular parameter count
EPS = 1e-3
OUT_ROWS = 8             # [x_pred(2) | q00 q01 q01 q11 (4) | pad(2)]


def _noise_model_kernel(xt_ref, w1t_ref, b1_ref, w2t_ref, b2_ref,
                        w3_ref, b3_ref, out_ref):
    xt = xt_ref[...]                                           # (N, TB) feature-major

    # --- fused first layers: dynamics.lin1 & enc.lin1 share LHS x -> one matmul
    h1 = jnp.dot(w1t_ref[...], xt,
                 preferred_element_type=jnp.float32) + b1_ref[...]      # (2*HID, TB)
    hd = jnp.maximum(h1[:HID, :], 0.0)                         # dynamics ReLU (HID, TB)
    he = jnp.tanh(h1[HID:, :])                                 # enc tanh      (HID, TB)

    # --- enc layer 2: (HID,HID) @ (HID,TB)
    he = jnp.tanh(jnp.dot(w2t_ref[...], he,
                          preferred_element_type=jnp.float32) + b2_ref[...])

    # --- fused tiny heads: block-diag (8, 2*HID) @ cat([hd; he]) -> (8, TB)
    cat = jnp.concatenate([hd, he], axis=0)                    # (2*HID, TB)
    head = jnp.dot(w3_ref[...], cat,
                   preferred_element_type=jnp.float32) + b3_ref[...]    # (8, TB)

    x_pred = xt + head[0:N, :]                                 # residual dynamics (2, TB)

    # --- triangular_param (n=2) + Q = L @ L^T, computed per lane
    l00 = jax.nn.softplus(head[2:3, :]) + EPS
    l10 = head[3:4, :]
    l11 = jax.nn.softplus(head[4:5, :]) + EPS
    q00 = l00 * l00
    q01 = l00 * l10                    # == q10 (Q symmetric)
    q11 = l10 * l10 + l11 * l11

    pad = jnp.zeros_like(x_pred)                               # 2 pad rows -> 8 sublanes
    out_ref[...] = jnp.concatenate([x_pred, q00, q01, q01, q11, pad], axis=0)


def _round_up(v, m):
    return ((v + m - 1) // m) * m


def _fuse_params(params):
    """Wrapper-side (pure glue) fusion/transposition of the 10 Linear params."""
    (dw1, db1, dw2, db2, ew1, eb1, ew2, eb2, hw, hb) = params
    f = jnp.float32
    w1t = jnp.concatenate([dw1, ew1], axis=1).T.astype(f)      # (2*HID, N)
    b1c = jnp.concatenate([db1, eb1], axis=1).T.astype(f)      # (2*HID, 1)
    w2t = ew2.T.astype(f)                                      # (HID, HID)
    b2c = eb2.T.astype(f)                                      # (HID, 1)
    w3 = jnp.zeros((OUT_ROWS, 2 * HID), f)                     # block-diag [[dw2^T,0],[0,hw^T]]
    w3 = w3.at[0:N, 0:HID].set(dw2.T.astype(f))
    w3 = w3.at[N:N + M, HID:2 * HID].set(hw.T.astype(f))
    b3 = jnp.zeros((OUT_ROWS, 1), f)
    b3 = b3.at[0:N, :].set(db2.T.astype(f))
    b3 = b3.at[N:N + M, :].set(hb.T.astype(f))
    return w1t, b1c, w2t, b2c, w3, b3


def noise_model_forward(x, params):
    """x: (B, N) float32. Returns (x_pred (B,N), Q (B,N,N))."""
    B = x.shape[0]
    w1t, b1c, w2t, b2c, w3, b3 = _fuse_params(params)

    # Batch tile: multiple of 128 lanes, capped so tiles stay small even on v7x
    # (64 MiB VMEM): at TB=1024 the activations + double-buffered I/O are ~2 MiB.
    TB = min(1024, _round_up(B, 128))
    B_pad = _round_up(B, TB)
    xt = jnp.pad(x.astype(jnp.float32).T, ((0, 0), (0, B_pad - B)))  # (N, B_pad)

    const = lambda i: (0, 0)   # weights: resident across all grid steps
    out = pl.pallas_call(
        _noise_model_kernel,
        out_shape=jax.ShapeDtypeStruct((OUT_ROWS, B_pad), jnp.float32),
        grid=(B_pad // TB,),
        in_specs=[
            pl.BlockSpec((N, TB), lambda i: (0, i)),           # x tile (lane-tiled batch)
            pl.BlockSpec((2 * HID, N), const),                 # fused W1^T
            pl.BlockSpec((2 * HID, 1), const),                 # fused b1
            pl.BlockSpec((HID, HID), const),                   # enc W2^T
            pl.BlockSpec((HID, 1), const),                     # enc b2
            pl.BlockSpec((OUT_ROWS, 2 * HID), const),          # block-diag head W
            pl.BlockSpec((OUT_ROWS, 1), const),                # block-diag head b
        ],
        out_specs=pl.BlockSpec((OUT_ROWS, TB), lambda i: (0, i)),
        compiler_params=pltpu.CompilerParams(
            dimension_semantics=("parallel",)),                # megacore shard on v7x
    )(xt, w1t, b1c, w2t, b2c, w3, b3)

    x_pred = out[0:N, :B].T                                    # (B, N)
    Q = out[N:N + N * N, :B].T.reshape(B, N, N)                # (B, N, N)
    return x_pred, Q


def init_params(key):
    """Deterministic synthetic parameters. Weights stored as (in, out)."""
    ks = jax.random.split(key, 10)
    f = jnp.float32
    dw1 = (jax.random.normal(ks[0], (N, HID)) * 0.3).astype(f)
    db1 = (jax.random.normal(ks[1], (1, HID)) * 0.1).astype(f)
    dw2 = (jax.random.normal(ks[2], (HID, N)) * 0.3).astype(f)
    db2 = (jax.random.normal(ks[3], (1, N)) * 0.1).astype(f)
    ew1 = (jax.random.normal(ks[4], (N, HID)) * 0.3).astype(f)
    eb1 = (jax.random.normal(ks[5], (1, HID)) * 0.1).astype(f)
    ew2 = (jax.random.normal(ks[6], (HID, HID)) * 0.1).astype(f)
    eb2 = (jax.random.normal(ks[7], (1, HID)) * 0.1).astype(f)
    hw = (jax.random.normal(ks[8], (HID, M)) * 0.1).astype(f)
    hb = (jax.random.normal(ks[9], (1, M)) * 0.1).astype(f)
    return (dw1, db1, dw2, db2, ew1, eb1, ew2, eb2, hw, hb)


def reference_forward(x, params):
    """Pure-JAX reference mirroring the PyTorch module semantics."""
    (dw1, db1, dw2, db2, ew1, eb1, ew2, eb2, hw, hb) = params
    x_pred = x + (jnp.maximum(x @ dw1 + db1, 0.0) @ dw2 + db2)
    e = jnp.tanh(x @ ew1 + eb1)
    e = jnp.tanh(e @ ew2 + eb2)
    vec = e @ hw + hb                                  # (B, 3)
    B = x.shape[0]
    L = jnp.zeros((B, N, N), jnp.float32)
    L = L.at[:, 0, 0].set(jax.nn.softplus(vec[:, 0]) + EPS)
    L = L.at[:, 1, 0].set(vec[:, 1])
    L = L.at[:, 1, 1].set(jax.nn.softplus(vec[:, 2]) + EPS)
    Q = L @ jnp.swapaxes(L, -1, -2)
    return x_pred, Q


if __name__ == "__main__":
    key = jax.random.PRNGKey(0)
    k_x, k_p = jax.random.split(key)
    B = 8
    x = jax.random.normal(k_x, (B, N), dtype=jnp.float32)
    params = init_params(k_p)

    x_pred, Q = noise_model_forward(x, params)
    jax.block_until_ready((x_pred, Q))

    x_pred_ref, Q_ref = reference_forward(x, params)
    assert jnp.allclose(x_pred, x_pred_ref, atol=1e-5, rtol=1e-5)
    assert jnp.allclose(Q, Q_ref, atol=1e-5, rtol=1e-5)

    print("KERNEL_OK")
</pallas_src>

<mosaic_0001>
module attributes {stable_mosaic.version = 11 : i64} {
  func.func @_noise_model_kernel(%arg0: i32, %arg1: memref<2x128xf32, #tpu.memory_space<vmem>>, %arg2: memref<128x2xf32, #tpu.memory_space<vmem>>, %arg3: memref<128x1xf32, #tpu.memory_space<vmem>>, %arg4: memref<64x64xf32, #tpu.memory_space<vmem>>, %arg5: memref<64x1xf32, #tpu.memory_space<vmem>>, %arg6: memref<8x128xf32, #tpu.memory_space<vmem>>, %arg7: memref<8x1xf32, #tpu.memory_space<vmem>>, %arg8: memref<8x128xf32, #tpu.memory_space<vmem>>) attributes {dimension_semantics = [#tpu.dimension_semantics<parallel>], iteration_bounds = array<i64: 1>, scalar_prefetch = 0 : i64, scratch_operands = 0 : i64, tpu.core_type = #tpu.core_type<tc>, window_params = [{transform_indices = @transform_0, window_bounds = array<i64: 2, 128>}, {pipeline_mode = #tpu.pipeline_mode<synchronous>, transform_indices = @transform_1, window_bounds = array<i64: 128, 2>}, {pipeline_mode = #tpu.pipeline_mode<synchronous>, transform_indices = @transform_2, window_bounds = array<i64: 128, 1>}, {pipeline_mode = #tpu.pipeline_mode<synchronous>, transform_indices = @transform_3, window_bounds = array<i64: 64, 64>}, {pipeline_mode = #tpu.pipeline_mode<synchronous>, transform_indices = @transform_4, window_bounds = array<i64: 64, 1>}, {pipeline_mode = #tpu.pipeline_mode<synchronous>, transform_indices = @transform_5, window_bounds = array<i64: 8, 128>}, {pipeline_mode = #tpu.pipeline_mode<synchronous>, transform_indices = @transform_6, window_bounds = array<i64: 8, 1>}, {transform_indices = @transform_7, window_bounds = array<i64: 8, 128>}]} {
    %c0 = arith.constant 0 : index
    %c0_0 = arith.constant 0 : index
    %0 = vector.load %arg1[%c0, %c0_0] : memref<2x128xf32, #tpu.memory_space<vmem>>, vector<2x128xf32>
    %c0_1 = arith.constant 0 : index
    %c0_2 = arith.constant 0 : index
    %1 = vector.load %arg2[%c0_1, %c0_2] : memref<128x2xf32, #tpu.memory_space<vmem>>, vector<128x2xf32>
    %cst = arith.constant dense<0.000000e+00> : vector<128x128xf32>
    %2 = tpu.matmul %1, %0, %cst {dimension_numbers = #tpu.dot_dimension_numbers<[1], [0], [0], [1], [0, 0, 1, 1], [], []>} : vector<128x2xf32>, vector<2x128xf32>, vector<128x128xf32> -> vector<128x128xf32>
    %c0_3 = arith.constant 0 : index
    %c0_4 = arith.constant 0 : index
    %3 = vector.load %arg3[%c0_3, %c0_4] : memref<128x1xf32, #tpu.memory_space<vmem>>, vector<128x1xf32>
    %4 = vector.broadcast %3 : vector<128x1xf32> to vector<128x128xf32>
    %5 = arith.addf %2, %4 : vector<128x128xf32>
    %6 = vector.extract_strided_slice %5 {offsets = [0, 0], sizes = [64, 128], strides = [1, 1]} : vector<128x128xf32> to vector<64x128xf32>
    %cst_5 = arith.constant 0.000000e+00 : f32
    %7 = vector.broadcast %cst_5 : f32 to vector<64x128xf32>
    %8 = arith.maximumf %6, %7 : vector<64x128xf32>
    %9 = vector.extract_strided_slice %5 {offsets = [64, 0], sizes = [64, 128], strides = [1, 1]} : vector<128x128xf32> to vector<64x128xf32>
    %10 = math.tanh %9 : vector<64x128xf32>
    %c0_6 = arith.constant 0 : index
    %c0_7 = arith.constant 0 : index
    %11 = vector.load %arg4[%c0_6, %c0_7] : memref<64x64xf32, #tpu.memory_space<vmem>>, vector<64x64xf32>
    %cst_8 = arith.constant dense<0.000000e+00> : vector<64x128xf32>
    %12 = tpu.matmul %11, %10, %cst_8 {dimension_numbers = #tpu.dot_dimension_numbers<[1], [0], [0], [1], [0, 0, 1, 1], [], []>} : vector<64x64xf32>, vector<64x128xf32>, vector<64x128xf32> -> vector<64x128xf32>
    %c0_9 = arith.constant 0 : index
    %c0_10 = arith.constant 0 : index
    %13 = vector.load %arg5[%c0_9, %c0_10] : memref<64x1xf32, #tpu.memory_space<vmem>>, vector<64x1xf32>
    %14 = vector.broadcast %13 : vector<64x1xf32> to vector<64x128xf32>
    %15 = arith.addf %12, %14 : vector<64x128xf32>
    %16 = math.tanh %15 : vector<64x128xf32>
    %17 = tpu.concatenate %8, %16 in 0 : vector<64x128xf32>, vector<64x128xf32> -> vector<128x128xf32>
    %c0_11 = arith.constant 0 : index
    %c0_12 = arith.constant 0 : index
    %18 = vector.load %arg6[%c0_11, %c0_12] : memref<8x128xf32, #tpu.memory_space<vmem>>, vector<8x128xf32>
    %cst_13 = arith.constant dense<0.000000e+00> : vector<8x128xf32>
    %19 = tpu.matmul %18, %17, %cst_13 {dimension_numbers = #tpu.dot_dimension_numbers<[1], [0], [0], [1], [0, 0, 1, 1], [], []>} : vector<8x128xf32>, vector<128x128xf32>, vector<8x128xf32> -> vector<8x128xf32>
    %c0_14 = arith.constant 0 : index
    %c0_15 = arith.constant 0 : index
    %20 = vector.load %arg7[%c0_14, %c0_15] : memref<8x1xf32, #tpu.memory_space<vmem>>, vector<8x1xf32>
    %21 = vector.broadcast %20 : vector<8x1xf32> to vector<8x128xf32>
    %22 = arith.addf %19, %21 : vector<8x128xf32>
    %23 = vector.extract_strided_slice %22 {offsets = [0, 0], sizes = [2, 128], strides = [1, 1]} : vector<8x128xf32> to vector<2x128xf32>
    %24 = arith.addf %0, %23 : vector<2x128xf32>
    %25 = vector.extract_strided_slice %22 {offsets = [2, 0], sizes = [1, 128], strides = [1, 1]} : vector<8x128xf32> to vector<1x128xf32>
    %cst_16 = arith.constant 0.000000e+00 : f32
    %26 = vector.broadcast %cst_16 : f32 to vector<1x128xf32>
    %27 = arith.maximumf %25, %26 : vector<1x128xf32>
    %28 = vector.broadcast %cst_16 : f32 to vector<1x128xf32>
    %29 = arith.subf %25, %28 : vector<1x128xf32>
    %30 = arith.cmpf one, %29, %29 : vector<1x128xf32>
    %31 = vector.broadcast %cst_16 : f32 to vector<1x128xf32>
    %32 = arith.addf %25, %31 : vector<1x128xf32>
    %33 = math.absf %29 : vector<1x128xf32>
    %cst_17 = arith.constant 0.000000e+00 : f32
    %34 = vector.broadcast %cst_17 : f32 to vector<1x128xf32>
    %35 = arith.subf %34, %33 : vector<1x128xf32>
    %36 = math.exp %35 : vector<1x128xf32>
    %37 = math.log1p %36 : vector<1x128xf32>
    %38 = arith.addf %27, %37 : vector<1x128xf32>
    %39 = arith.select %30, %32, %38 : vector<1x128xi1>, vector<1x128xf32>
    %cst_18 = arith.constant 1.000000e-03 : f32
    %40 = vector.broadcast %cst_18 : f32 to vector<1x128xf32>
    %41 = arith.addf %39, %40 : vector<1x128xf32>
    %42 = vector.extract_strided_slice %22 {offsets = [3, 0], sizes = [1, 128], strides = [1, 1]} : vector<8x128xf32> to vector<1x128xf32>
    %43 = vector.extract_strided_slice %22 {offsets = [4, 0], sizes = [1, 128], strides = [1, 1]} : vector<8x128xf32> to vector<1x128xf32>
    %cst_19 = arith.constant 0.000000e+00 : f32
    %44 = vector.broadcast %cst_19 : f32 to vector<1x128xf32>
    %45 = arith.maximumf %43, %44 : vector<1x128xf32>
    %46 = vector.broadcast %cst_19 : f32 to vector<1x128xf32>
    %47 = arith.subf %43, %46 : vector<1x128xf32>
    %48 = arith.cmpf one, %47, %47 : vector<1x128xf32>
    %49 = vector.broadcast %cst_19 : f32 to vector<1x128xf32>
    %50 = arith.addf %43, %49 : vector<1x128xf32>
    %51 = math.absf %47 : vector<1x128xf32>
    %cst_20 = arith.constant 0.000000e+00 : f32
    %52 = vector.broadcast %cst_20 : f32 to vector<1x128xf32>
    %53 = arith.subf %52, %51 : vector<1x128xf32>
    %54 = math.exp %53 : vector<1x128xf32>
    %55 = math.log1p %54 : vector<1x128xf32>
    %56 = arith.addf %45, %55 : vector<1x128xf32>
    %57 = arith.select %48, %50, %56 : vector<1x128xi1>, vector<1x128xf32>
    %cst_21 = arith.constant 1.000000e-03 : f32
    %58 = vector.broadcast %cst_21 : f32 to vector<1x128xf32>
    %59 = arith.addf %57, %58 : vector<1x128xf32>
    %60 = arith.mulf %41, %41 : vector<1x128xf32>
    %61 = arith.mulf %41, %42 : vector<1x128xf32>
    %62 = arith.mulf %42, %42 : vector<1x128xf32>
    %63 = arith.mulf %59, %59 : vector<1x128xf32>
    %64 = arith.addf %62, %63 : vector<1x128xf32>
    %cst_22 = arith.constant 0.000000e+00 : f32
    %65 = vector.broadcast %cst_22 : f32 to vector<2x128xf32>
    %66 = tpu.concatenate %24, %60, %61, %61, %64, %65 in 0 : vector<2x128xf32>, vector<1x128xf32>, vector<1x128xf32>, vector<1x128xf32>, vector<1x128xf32>, vector<2x128xf32> -> vector<8x128xf32>
    %c0_23 = arith.constant 0 : index
    %c0_24 = arith.constant 0 : index
    %67 = vector.load %arg8[%c0_23, %c0_24] : memref<8x128xf32, #tpu.memory_space<vmem>>, vector<8x128xf32>
    tpu.vector_store %arg8[%c0_23, %c0_24], %66 {strides = array<i32>} : memref<8x128xf32, #tpu.memory_space<vmem>>, vector<8x128xf32>,
    return
  }
  func.func @transform_0(%arg0: i32) -> (i32, i32) {
    %c0_i32 = arith.constant 0 : i32
    %c0_i32_0 = arith.constant 0 : i32
    return %c0_i32, %arg0 : i32, i32
  }
  func.func @transform_1(%arg0: i32) -> (i32, i32) {
    %c0_i32 = arith.constant 0 : i32
    %c0_i32_0 = arith.constant 0 : i32
    %c0_i32_1 = arith.constant 0 : i32
    return %c0_i32, %c0_i32_0 : i32, i32
  }
  func.func @transform_2(%arg0: i32) -> (i32, i32) {
    %c0_i32 = arith.constant 0 : i32
    %c0_i32_0 = arith.constant 0 : i32
    %c0_i32_1 = arith.constant 0 : i32
    return %c0_i32, %c0_i32_0 : i32, i32
  }
  func.func @transform_3(%arg0: i32) -> (i32, i32) {
    %c0_i32 = arith.constant 0 : i32
    %c0_i32_0 = arith.constant 0 : i32
    %c0_i32_1 = arith.constant 0 : i32
    return %c0_i32, %c0_i32_0 : i32, i32
  }
  func.func @transform_4(%arg0: i32) -> (i32, i32) {
    %c0_i32 = arith.constant 0 : i32
    %c0_i32_0 = arith.constant 0 : i32
    %c0_i32_1 = arith.constant 0 : i32
    return %c0_i32, %c0_i32_0 : i32, i32
  }
  func.func @transform_5(%arg0: i32) -> (i32, i32) {
    %c0_i32 = arith.constant 0 : i32
    %c0_i32_0 = arith.constant 0 : i32
    %c0_i32_1 = arith.constant 0 : i32
    return %c0_i32, %c0_i32_0 : i32, i32
  }
  func.func @transform_6(%arg0: i32) -> (i32, i32) {
    %c0_i32 = arith.constant 0 : i32
    %c0_i32_0 = arith.constant 0 : i32
    %c0_i32_1 = arith.constant 0 : i32
    return %c0_i32, %c0_i32_0 : i32, i32
  }
  func.func @transform_7(%arg0: i32) -> (i32, i32) {
    %c0_i32 = arith.constant 0 : i32
    %c0_i32_0 = arith.constant 0 : i32
    return %c0_i32, %arg0 : i32, i32
  }
}

</mosaic_0001>

<bundles_post_ra>
// kernel: tpu_custom_call.1
= control target key start
LH: loop header
LB: loop body
LE: loop exit
PB: predicated region body
PF: predicated region fallthrough
CT: control target
= control target key end

     0   :  { %vm189_vm0 = vcmask 1041408   ;;  %vm140_vm1 = vcmask 15360   ;;  %v915_v4 = vmov 0   ;;  %s1188_s0 = inlined_call_operand.vmem [shape: f32[2,128], index: 0, kind: input, shape index: {}]   ;;  %s1189_s1 = inlined_call_operand.vmem [shape: f32[128,2], index: 1, kind: input, shape index: {}]   ;;  %s1190_s2 = inlined_call_operand.vmem [shape: f32[128,1], index: 2, kind: input, shape index: {}]   ;;  %s1191_s3 = inlined_call_operand.vmem [shape: f32[64,64], index: 3, kind: input, shape index: {}]   ;;  %s1192_s4 = inlined_call_operand.vmem [shape: f32[64,1], index: 4, kind: input, shape index: {}]   ;;  %s1193_s5 = inlined_call_operand.vmem [shape: f32[8,128], index: 5, kind: input, shape index: {}]   ;;  %s1194_s6 = inlined_call_operand.vmem [shape: f32[8,1], index: 6, kind: input, shape index: {}]   ;;  %s1195_s7 = inlined_call_operand.hbm [shape: f32[8,128], index: 7, kind: output, shape index: {}]  }
   0x1   :  { %v962_v0 = vld [vmem:[%s1188_s0] sm:$0x3]  ;;  %v29_v2 = vld [vmem:[%s1189_s1 + $0x8] sm:$0xff]  ;;  %v30_v3 = vld [vmem:[%s1189_s1 + $0x10] sm:$0xff]  ;;  %855 = vset.pattern.permute.xlu0 %v915_v4  ;;  %856 = vset.pattern.permute.xlu1 %v915_v4 }
   0x2   :  { %v28_v1 = vld [vmem:[%s1189_s1] sm:$0xff]  ;;  %762 = vmatprep.subr.msk.mxu0 %vm189_vm0, %v962_v0  ;;  %v31_v5 = vld [vmem:[%s1189_s1 + $0x18] sm:$0xff]  ;;  %v57_v8 = vld [vmem:[%s1190_s2 + $0x68] sm:$0xff] }
   0x3   :  { %764 = vmatprep.mubr.msk.f32.mxu0 %vm140_vm1, %v28_v1  ;;  %763 = vmatpush3.msk.msra.mxu0 %vm189_vm0, %v962_v0  ;;  %v32_v6 = vld [vmem:[%s1189_s1 + $0x20] sm:$0xff]  ;;  %v59_v7 = vld [vmem:[%s1190_s2 + $0x78] sm:$0xff]  ;;  %v58_v9 = vld [vmem:[%s1190_s2 + $0x70] sm:$0xff] }
   0x4   :  { %765 = vmatmul.mubr.msk.f32.vlgmr.msra.gmra.mxu0 %vm140_vm1, %v29_v2  ;;  %137 = vperm.xlu0 %855, %v59_v7   ;;  %v56_v10 = vld [vmem:[%s1190_s2 + $0x60] sm:$0xff]  ;;  %v33_v11 = vld [vmem:[%s1189_s1 + $0x28] sm:$0xff]  ;;  %v34_v12 = vld [vmem:[%s1189_s1 + $0x30] sm:$0xff] }
   0x5   :  { %767 = vmatprep.mubr.msk.f32.mxu0 %vm140_vm1, %v30_v3  ;;  %127 = vperm.xlu1 %856, %v57_v8   ;;  %v55_v13 = vld [vmem:[%s1190_s2 + $0x58] sm:$0xff]  ;;  %v54_v14 = vld [vmem:[%s1190_s2 + $0x50] sm:$0xff]  ;;  %v36_v16 = vld [vmem:[%s1189_s1 + $0x40] sm:$0xff] }
   0x6   :  { %v35_v15 = vld [vmem:[%s1189_s1 + $0x38] sm:$0xff] }
   0x8   :  { %768 = vmatmul.mubr.msk.f32.gmra.mxu0 %vm140_vm1, %v31_v5  ;;  %132 = vperm.xlu0 %855, %v58_v9  }
   0x9   :  { %770 = vmatprep.mubr.msk.f32.mxu0 %vm140_vm1, %v32_v6  ;;  %122 = vperm.xlu1 %856, %v56_v10  }
   0xc   :  { %771 = vmatmul.mubr.msk.f32.gmra.mxu0 %vm140_vm1, %v33_v11  ;;  %117 = vperm.xlu0 %855, %v55_v13  }
   0xd   :  { %773 = vmatprep.mubr.msk.f32.mxu0 %vm140_vm1, %v34_v12  ;;  %112 = vperm.xlu1 %856, %v54_v14  }
   0xe   :  { %12 = vsyncpa [#allocation3], 0  ;;  %v53_v17 = vld [vmem:[%s1190_s2 + $0x48] sm:$0xff]  ;;  %v52_v18 = vld [vmem:[%s1190_s2 + $0x40] sm:$0xff]  ;;  %vm410_vm2 = vcmask 523264   ;;  %vm917_vm3 = vmmov 0  }
   0xf   :  { %v37_v19 = vld [vmem:[%s1189_s1 + $0x48] sm:$0xff]  ;;  %v38_v20 = vld [vmem:[%s1189_s1 + $0x50] sm:$0xff]  ;;  %v369_v21 = vld [vmem:[%s1192_s4 + $0x38] sm:$0xff]  ;;  %vm664_vm6 = vcmask 1042432   ;;  %vm666_vm7 = vcmask 1043456   ;;  %vm668_vm8 = vcmask 1044480  }
  0x10   :  { %774 = vmatmul.mubr.msk.f32.gmra.mxu0 %vm140_vm1, %v35_v15  ;;  %107 = vperm.xlu0 %855, %v53_v17   ;;  %v368_v22 = vld [vmem:[%s1192_s4 + $0x30] sm:$0xff]  ;;  %v39_v23 = vld [vmem:[%s1189_s1 + $0x58] sm:$0xff]  ;;  %v40_v24 = vld [vmem:[%s1189_s1 + $0x60] sm:$0xff]  ;;  %vm670_vm9 = vcmask 1045504  }
  0x11   :  { %776 = vmatprep.mubr.msk.f32.mxu0 %vm140_vm1, %v36_v16  ;;  %102 = vperm.xlu1 %856, %v52_v18   ;;  %v367_v25 = vld [vmem:[%s1192_s4 + $0x28] sm:$0xff]  ;;  %v366_v26 = vld [vmem:[%s1192_s4 + $0x20] sm:$0xff]  ;;  %v42_v28 = vld [vmem:[%s1189_s1 + $0x70] sm:$0xff] }
  0x12   :  { %v41_v27 = vld [vmem:[%s1189_s1 + $0x68] sm:$0xff]  ;;  %v365_v29 = vld [vmem:[%s1192_s4 + $0x18] sm:$0xff]  ;;  %v364_v30 = vld [vmem:[%s1192_s4 + $0x10] sm:$0xff] }
  0x13   :  { %v43_v31 = vld [vmem:[%s1189_s1 + $0x78] sm:$0xff]  ;;  %v363_v32 = vld [vmem:[%s1192_s4 + $0x8] sm:$0xff]  ;;  %v362_v33 = vld [vmem:[%s1192_s4] sm:$0xff] }
  0x14   :  { %777 = vmatmul.mubr.msk.f32.gmra.mxu0 %vm140_vm1, %v37_v19  ;;  %407 = vperm.xlu0 %855, %v369_v21   ;;  %v51_v34 = vld [vmem:[%s1190_s2 + $0x38] sm:$0xff]  ;;  %v50_v35 = vld [vmem:[%s1190_s2 + $0x30] sm:$0xff]  ;;  %v49_v36 = vld [vmem:[%s1190_s2 + $0x28] sm:$0xff] }
  0x15   :  { %779 = vmatprep.mubr.msk.f32.mxu0 %vm140_vm1, %v38_v20  ;;  %402 = vperm.xlu1 %856, %v368_v22   ;;  %v48_v37 = vld [vmem:[%s1190_s2 + $0x20] sm:$0xff]  ;;  %v47_v38 = vld [vmem:[%s1190_s2 + $0x18] sm:$0xff]  ;;  %v46_v39 = vld [vmem:[%s1190_s2 + $0x10] sm:$0xff] }
  0x16   :  { %v45_v40 = vld [vmem:[%s1190_s2 + $0x8] sm:$0xff]  ;;  %v44_v41 = vld [vmem:[%s1190_s2] sm:$0xff]  ;;  %v356_v22 = vld [vmem:[%s1191_s3 + $0x10] sm:$0xff] }
  0x17   :  { %v549_v42 = vld [vmem:[%s1194_s6] sm:$0xff]  ;;  %v355_v21 = vld [vmem:[%s1191_s3 + $0x8] sm:$0xff] }
  0x18   :  { %780 = vmatmul.mubr.msk.f32.gmra.mxu0 %vm140_vm1, %v39_v23  ;;  %397 = vperm.xlu0 %855, %v367_v25   ;;  %v354_v43 = vld [vmem:[%s1191_s3] sm:$0xff]  ;;  %v357_v23 = vld [vmem:[%s1191_s3 + $0x18] sm:$0xff]  ;;  %v359_v25 = vld [vmem:[%s1191_s3 + $0x28] sm:$0xff] }
  0x19   :  { %782 = vmatprep.mubr.msk.f32.mxu0 %vm140_vm1, %v40_v24  ;;  %392 = vperm.xlu1 %856, %v366_v26   ;;  %v358_v24 = vld [vmem:[%s1191_s3 + $0x20] sm:$0xff]  ;;  %v360_v26 = vld [vmem:[%s1191_s3 + $0x30] sm:$0xff] }
  0x1a   :  { %804 = vmatprep.mubr.msk.f32.mxu1 %vm410_vm2, %v354_v43 }
  0x1c   :  { %783 = vmatmul.mubr.msk.f32.gmra.mxu0 %vm140_vm1, %v41_v27  ;;  %387 = vperm.xlu0 %855, %v365_v29   ;;  %v361_v27 = vld [vmem:[%s1191_s3 + $0x38] sm:$0xff] }
  0x1d   :  { %785 = vmatprep.mubr.msk.f32.mxu0 %vm140_vm1, %v42_v28  ;;  %382 = vperm.xlu1 %856, %v364_v30   ;;  %v916_v28 = vmov 0.0  }
  0x1e   :  { %816 = vmatprep.subr.mxu0 %v916_v28 }
  0x20   :  { %786 = vmatmul.mubr.msk.f32.gmra.mxu0 %vm140_vm1, %v43_v31  ;;  %377 = vperm.xlu0 %855, %v363_v32  }
  0x21   :  { %372 = vperm.xlu1 %856, %v362_v33   ;;  %848 = vmatprep.mubr.msk.f32.mxu0 %vm917_vm3, %v916_v28 }
  0x24   :  { %97 = vperm.xlu0 %855, %v51_v34  }
  0x25   :  { %92 = vperm.xlu1 %856, %v50_v35  }
  0x28   :  { %87 = vperm.xlu0 %855, %v49_v36  }
  0x29   :  { %82 = vperm.xlu1 %856, %v48_v37  }
  0x2c   :  { %77 = vperm.xlu0 %855, %v47_v38  }
  0x2d   :  { %72 = vperm.xlu1 %856, %v46_v39  }
  0x30   :  { %67 = vperm.xlu0 %855, %v45_v40  }
  0x31   :  { %62 = vperm.xlu1 %856, %v44_v41  }
  0x34   :  { %552 = vperm.xlu0 %855, %v549_v42  }
  0x7f   :  { %v138_v54 = vpop.permute.xlu0 %137 }
  0x80   :  { %v128_v56 = vpop.permute.xlu1 %127 }
  0x83   :  { %v133_v59 = vpop.permute.xlu0 %132 }
  0x84   :  { %v123_v61 = vpop.permute.xlu1 %122 }
  0x87   :  { %v118_v4 = vpop.permute.xlu0 %117 }
  0x88   :  { %v113_v6 = vpop.permute.xlu1 %112 }
  0x8b   :  { %v108_v9 = vpop.permute.xlu0 %107 }
  0x8c   :  { %v103_v11 = vpop.permute.xlu1 %102 }
  0x8f   :  { %v408_v31 = vpop.permute.xlu0 %407 }
  0x90   :  { %v403_v33 = vpop.permute.xlu1 %402 }
  0x93   :  { %v398_v36 = vpop.permute.xlu0 %397 }
  0x94   :  { %v393_v38 = vpop.permute.xlu1 %392 }
  0xc4   :  { %v1111_v44 = vpop.f32.mrf.mxu0 }
  0xc6   :  { %v1113_v45 = vpop.f32.mrf.mxu0 }
  0xc8   :  { %v1115_v46 = vpop.f32.mrf.mxu0 }
  0xca   :  { %v1117_v47 = vpop.f32.mrf.mxu0 }
  0xcc   :  { %v1119_v48 = vpop.f32.mrf.mxu0 }
  0xce   :  { %v1121_v49 = vpop.f32.mrf.mxu0 }
  0xd0   :  { %v1123_v50 = vpop.f32.mrf.mxu0 }
  0xd2   :  { %v1125_v51 = vpop.f32.mrf.mxu0 }
  0xd4   :  { %v778_v52 = vpop.f32.mrf.mxu0 }
  0xd5   :  { %v305_v10 = vadd.f32 %v778_v52, %v108_v9  ;;  %v388_v52 = vpop.permute.xlu0 %387 }
  0xd6   :  { %v299_v53 = vpop.f32.mrf.mxu0 }
  0xd7   :  { %v300_v12 = vadd.f32 %v299_v53, %v103_v11 }
  0xd8   :  { %v781_v55 = vpop.f32.mrf.mxu0 }
  0xd9   :  { %v315_v7 = vadd.f32 %v781_v55, %v118_v4 }
  0xda   :  { %v309_v57 = vpop.f32.mrf.mxu0 }
  0xdb   :  { %v310_v8 = vadd.f32 %v309_v57, %v113_v6  ;;  %v378_v57 = vpop.permute.xlu0 %377 }
  0xdc   :  { %v784_v58 = vpop.f32.mrf.mxu0 }
  0xdd   :  { %v325_v2 = vadd.f32 %v784_v58, %v128_v56 }
  0xde   :  { %v319_v60 = vpop.f32.mrf.mxu0 }
  0xdf   :  { %v320_v5 = vadd.f32 %v319_v60, %v123_v61 }
  0xe0   :  { %v787_v62 = vpop.f32.mrf.mxu0 }
  0xe1   :  { %v335_v63 = vadd.f32 %v787_v62, %v138_v54  ;;  %v383_v54 = vpop.permute.xlu1 %382 }
  0xe2   :  { %v329_v1 = vpop.f32.mrf.mxu0 }
  0xe3   :  { %857 = vtanh.f32 %v335_v63  ;;  %v330_v3 = vadd.f32 %v329_v1, %v133_v59  ;;  %v98_v63 = vpop.permute.xlu0 %97 }
  0xe5   :  { %859 = vtanh.f32 %v330_v3  ;;  %v373_v59 = vpop.permute.xlu1 %372 }
  0xe6   :  { %861 = vtanh.f32 %v325_v2 }
  0xe7   :  { %863 = vtanh.f32 %v320_v5  ;;  %v88_v5 = vpop.permute.xlu0 %87 }
  0xe8   :  { %865 = vtanh.f32 %v315_v7 }
  0xe9   :  { %867 = vtanh.f32 %v310_v8  ;;  %v93_v2 = vpop.permute.xlu1 %92  ;;  %v295_v8 = vadd.f32 %v1123_v50, %v98_v63 }
  0xea   :  { %869 = vtanh.f32 %v305_v10  ;;  %v290_v10 = vadd.f32 %v1125_v51, %v93_v2 }
  0xeb   :  { %871 = vtanh.f32 %v300_v12  ;;  %v78_v12 = vpop.permute.xlu0 %77 }
  0xec   :  { %v275_v51 = vadd.f32 %v1115_v46, %v78_v12 }
  0xed   :  { %v83_v7 = vpop.permute.xlu1 %82 }
  0xee   :  { %v280_v50 = vadd.f32 %v1121_v49, %v83_v7 }
  0xf0   :  { %v858_v13 = vpop.eup %857 }
  0xf1   :  { %788 = vmatprep.subr.mxu1 %v858_v13 }
  0xf2   :  { %v860_v14 = vpop.eup %859  ;;  %789 = vmatpush3.msra.mxu1 %v858_v13  ;;  %v285_v13 = vadd.f32 %v1119_v48, %v88_v5 }
  0xf3   :  { %790 = vmatprep.subr.mxu1 %v860_v14  ;;  %v862_v15 = vpop.eup %861 }
  0xf4   :  { %791 = vmatpush3.msra.mxu1 %v860_v14  ;;  %v864_v16 = vpop.eup %863  ;;  %v345_v14 = vmax.f32 %v295_v8, 0.0 }
  0xf5   :  { %792 = vmatprep.subr.mxu1 %v862_v15  ;;  %v866_v17 = vpop.eup %865 }
  0xf6   :  { %793 = vmatpush3.msra.mxu1 %v862_v15  ;;  %v868_v18 = vpop.eup %867  ;;  %v73_v15 = vpop.permute.xlu1 %72 }
  0xf7   :  { %794 = vmatprep.subr.mxu1 %v864_v16  ;;  %v870_v19 = vpop.eup %869  ;;  %v270_v48 = vadd.f32 %v1117_v47, %v73_v15 }
  0xf8   :  { %795 = vmatpush3.msra.mxu1 %v864_v16  ;;  %v872_v20 = vpop.eup %871  ;;  %v344_v16 = vmax.f32 %v290_v10, 0.0 }
  0xf9   :  { %796 = vmatprep.subr.mxu1 %v866_v17 }
  0xfa   :  { %797 = vmatpush3.msra.mxu1 %v866_v17  ;;  %v343_v17 = vmax.f32 %v285_v13, 0.0 }
  0xfb   :  { %798 = vmatprep.subr.mxu1 %v868_v18 }
  0xfc   :  { %799 = vmatpush3.msra.mxu1 %v868_v18  ;;  %v68_v18 = vpop.permute.xlu0 %67 }
  0xfd   :  { %800 = vmatprep.subr.mxu1 %v870_v19  ;;  %v265_v49 = vadd.f32 %v1111_v44, %v68_v18  ;;  %v548_v44 = vld [vmem:[%s1193_s5] sm:$0xff]  ;;  %s918_s5 = smov [#allocation2]  }
  0xfe   :  { %801 = vmatpush3.msra.mxu1 %v870_v19  ;;  %v342_v19 = vmax.f32 %v280_v50, 0.0  ;;  %s679_s24 = sshll.u32 %s918_s5, 4  ;;  %s680_s24 = int_to_ptr.vmem [resolvable:$true] %s679_s24 }
  0xff   :  { %802 = vmatprep.subr.mxu1 %v872_v20  ;;  %s893_s4 = scalar_lea.vmem %s680_s24, 128  ;;  %p898_p1 = scmp.lt.s32.totalorder %s680_s24, %s680_s24 }
 0x100   :  { %803 = vmatpush3.msra.mxu1 %v872_v20  ;;  %v63_v20 = vpop.permute.xlu1 %62  ;;  %p894_p0 = scmp.ne.s32.totalorder %s680_s24, %s893_s4  ;;  %p899_p2 = scmp.lt.s32.totalorder %s893_s4, %s893_s4 }
 0x101   :  { %805 = vmatmul.mubr.msk.f32.vlgmr.msra.gmra.mxu1 %vm410_vm2, %v355_v21  ;;  %v341_v21 = vmax.f32 %v275_v51, 0.0  ;;  %v260_v46 = vadd.f32 %v1113_v45, %v63_v20 }
 0x102   :  { %807 = vmatprep.mubr.msk.f32.mxu1 %vm410_vm2, %v356_v22  ;;  %v340_v22 = vmax.f32 %v270_v48, 0.0  ;;  %p900_p3 = por %p899_p2, %p898_p1 }
 0x103   :  { %v338_v47 = vmax.f32 %v260_v46, 0.0 }
 0x104   :  { %p901_p4 = pnand %p900_p3, %p894_p0 }
 0x105   :  { %808 = vmatmul.mubr.msk.f32.gmra.mxu1 %vm410_vm2, %v357_v23  ;;  %v339_v23 = vmax.f32 %v265_v49, 0.0 }
 0x106   :  { %810 = vmatprep.mubr.msk.f32.mxu1 %vm410_vm2, %v358_v24  ;;  %v553_v24 = vpop.permute.xlu0 %552 }
 0x109   :  { %811 = vmatmul.mubr.msk.f32.gmra.mxu1 %vm410_vm2, %v359_v25 }
 0x10a   :  { %813 = vmatprep.mubr.msk.f32.mxu1 %vm410_vm2, %v360_v26 }
 0x10d   :  { %814 = vmatmul.mubr.msk.f32.gmra.mxu1 %vm410_vm2, %v361_v27 }
 0x1c1   :  { %v806_v29 = vpop.f32.mrf.mxu1 }
 0x1c2   :  { %v507_v58 = vadd.f32 %v806_v29, %v378_v57 }
 0x1c3   :  { %v501_v30 = vpop.f32.mrf.mxu1 }
 0x1c4   :  { %v502_v60 = vadd.f32 %v501_v30, %v373_v59 }
 0x1c5   :  { %v809_v32 = vpop.f32.mrf.mxu1 }
 0x1c6   :  { %v517_v55 = vadd.f32 %v809_v32, %v388_v52 }
 0x1c7   :  { %v511_v34 = vpop.f32.mrf.mxu1 }
 0x1c8   :  { %v512_v56 = vadd.f32 %v511_v34, %v383_v54 }
 0x1c9   :  { %v812_v35 = vpop.f32.mrf.mxu1 }
 0x1ca   :  { %v527_v42 = vadd.f32 %v812_v35, %v398_v36 }
 0x1cb   :  { %v521_v37 = vpop.f32.mrf.mxu1 }
 0x1cc   :  { %v522_v53 = vadd.f32 %v521_v37, %v393_v38 }
 0x1cd   :  { %v815_v39 = vpop.f32.mrf.mxu1 }
 0x1ce   :  { %v537_v40 = vadd.f32 %v815_v39, %v408_v31 }
 0x1cf   :  { %v531_v41 = vpop.f32.mrf.mxu1 }
 0x1d0   :  { %873 = vtanh.f32 %v537_v40  ;;  %v532_v43 = vadd.f32 %v531_v41, %v403_v33 }
 0x1d2   :  { %875 = vtanh.f32 %v532_v43 }
 0x1d3   :  { %877 = vtanh.f32 %v527_v42 }
 0x1d4   :  { %879 = vtanh.f32 %v522_v53 }
 0x1d5   :  { %881 = vtanh.f32 %v517_v55 }
 0x1d6   :  { %883 = vtanh.f32 %v512_v56 }
 0x1d7   :  { %885 = vtanh.f32 %v507_v58 }
 0x1d8   :  { %887 = vtanh.f32 %v502_v60 }
 0x1dd   :  { %v874_v61 = vpop.eup %873 }
 0x1de   :  { %817 = vmatpush3.msra.mxu0 %v874_v61 }
 0x1df   :  { %v876_v62 = vpop.eup %875  ;;  %818 = vmatprep.subr.mxu0 %v916_v28 }
 0x1e0   :  { %819 = vmatpush3.msra.mxu0 %v876_v62  ;;  %v878_v1 = vpop.eup %877 }
 0x1e1   :  { %820 = vmatprep.subr.mxu0 %v916_v28  ;;  %v880_v3 = vpop.eup %879 }
 0x1e2   :  { %821 = vmatpush3.msra.mxu0 %v878_v1  ;;  %v882_v4 = vpop.eup %881 }
 0x1e3   :  { %822 = vmatprep.subr.mxu0 %v916_v28  ;;  %v884_v6 = vpop.eup %883 }
 0x1e4   :  { %823 = vmatpush3.msra.mxu0 %v880_v3  ;;  %v886_v9 = vpop.eup %885 }
 0x1e5   :  { %824 = vmatprep.subr.mxu0 %v916_v28  ;;  %v888_v11 = vpop.eup %887 }
 0x1e6   :  { %825 = vmatpush3.msra.mxu0 %v882_v4 }
 0x1e7   :  { %826 = vmatprep.subr.mxu0 %v916_v28 }
 0x1e8   :  { %827 = vmatpush3.msra.mxu0 %v884_v6 }
 0x1e9   :  { %828 = vmatprep.subr.mxu0 %v916_v28 }
 0x1ea   :  { %829 = vmatpush3.msra.mxu0 %v886_v9 }
 0x1eb   :  { %830 = vmatprep.subr.mxu0 %v916_v28 }
 0x1ec   :  { %831 = vmatpush3.msra.mxu0 %v888_v11 }
 0x1ed   :  { %832 = vmatprep.subr.mxu0 %v916_v28 }
 0x1ee   :  { %833 = vmatpush3.msra.mxu0 %v345_v14 }
 0x1ef   :  { %834 = vmatprep.subr.mxu0 %v916_v28 }
 0x1f0   :  { %835 = vmatpush3.msra.mxu0 %v344_v16 }
 0x1f1   :  { %836 = vmatprep.subr.mxu0 %v916_v28 }
 0x1f2   :  { %837 = vmatpush3.msra.mxu0 %v343_v17 }
 0x1f3   :  { %838 = vmatprep.subr.mxu0 %v916_v28 }
 0x1f4   :  { %839 = vmatpush3.msra.mxu0 %v342_v19 }
 0x1f5   :  { %840 = vmatprep.subr.mxu0 %v916_v28 }
 0x1f6   :  { %841 = vmatpush3.msra.mxu0 %v341_v21 }
 0x1f7   :  { %842 = vmatprep.subr.mxu0 %v916_v28 }
 0x1f8   :  { %843 = vmatpush3.msra.mxu0 %v340_v22 }
 0x1f9   :  { %844 = vmatprep.subr.mxu0 %v916_v28 }
 0x1fa   :  { %845 = vmatpush3.msra.mxu0 %v339_v23 }
 0x1fb   :  { %846 = vmatprep.subr.mxu0 %v916_v28 }
 0x1fc   :  { %847 = vmatpush3.msra.mxu0 %v338_v47 }
 0x1fd   :  { %849 = vmatmul.mubr.f32.vlgmr.msra.gmra.mxu0 %v548_v44 }
 0x2bd   :  { %v621_v45 = vpop.f32.mrf.mxu0 }
 0x2be   :  { %v622_v25 = vadd.f32 %v621_v45, %v553_v24 }
 0x2bf   :  { %v850_v26 = vpop.f32.mrf.mxu0 }
 0x2c0   :  { %v629_v27 = vand.u32 2147483647, %v622_v25  ;;  %v626_v28 = vmax.f32 %v622_v25, 0.0  ;;  %vm627_vm5 = vcmp.ne.f32.partialorder %v622_v25, %v622_v25  ;;  %v647_v43 = vrot.slane %v622_v25, 1 }
 0x2c1   :  { %v625_v52 = vadd.f32 %v622_v25, %v962_v0  ;;  %v650_v55 = vmul.f32 %v622_v25, %v622_v25 }
 0x2c2   :  { %v630_v29 = vsub.f32 0.0, %v629_v27 }
 0x2c4   :  { %v631_v30 = vmul.f32 1.442695, %v630_v29 }
 0x2c6   :  { %889 = vpow2.f32 %v631_v30 }
 0x2d3   :  { %v890_v31 = vpop.eup %889 }
 0x2d4   :  { %v633_v32 = vadd.f32 1.0, %v890_v31  ;;  %v636_v33 = vmul.f32 -0.5, %v890_v31  ;;  %v639_v35 = vand.u32 2147483647, %v890_v31 }
 0x2d6   :  { %891 = vlog2.f32 %v633_v32  ;;  %v637_v34 = vadd.f32 1.0, %v636_v33  ;;  %vm640_vm4 = vcmp.lt.f32.partialorder %v639_v35, 0.0004427343 }
 0x2d8   :  { %v638_v38 = vmul.f32 %v890_v31, %v637_v34 }
 0x2e3   :  { %v892_v36 = vpop.eup %891 }
 0x2e4   :  { %v635_v37 = vmul.f32 0.6931472, %v892_v36 }
 0x2e6   :  { %v641_v39 = vsel %vm640_vm4, %v638_v38, %v635_v37 }
 0x2e7   :  { %v642_v40 = vadd.f32 %v641_v39, %v626_v28 }
 0x2e9   :  { %v643_v41 = vsel %vm627_vm5, %v622_v25, %v642_v40 }
 0x2ea   :  { %v644_v42 = vadd.f32 0.001, %v643_v41 }
 0x2ec   :  { %v645_v53 = vmul.f32 %v644_v42, %v644_v42  ;;  %v649_v54 = vmul.f32 %v647_v43, %v644_v42 }
 0x2ee   :  { %v652_v56 = vrot.slane %v645_v53, 1  ;;  %v656_v57 = vrot.slane %v649_v54, 7  ;;  %v663_v58 = vsel %vm189_vm0, %v625_v52, %v645_v53  ;;  %v658_v59 = vrot.slane %v649_v54, 6 }
 0x2f0   :  { %v654_v60 = vadd.f32 %v652_v56, %v650_v55  ;;  %v665_v61 = vsel %vm664_vm6, %v663_v58, %v656_v57 }
 0x2f1   :  { %v667_v63 = vsel %vm666_vm7, %v665_v61, %v658_v59 }
 0x2f2   :  { %v661_v62 = vrot.slane %v654_v60, 6 }
 0x2f4   :  { %v669_v1 = vsel %vm668_vm8, %v667_v63, %v661_v62 }
 0x2f5   :  { %v671_v0 = vsel %vm670_vm9, %v669_v1, 0.0 }
 0x2f6   :  { %672 = vst [vmem:[#allocation2] sm:$0xff] %v671_v0 }
 0x2f7   :  { %904 = shalt.err (!%p901_p4)
}
 0x2f8   :  { %682 = dma.vmem_to_hbm [thread:$0]  %s680_s24, 128, %s1195_s7, [#allocation3]  }
 0x2f9   :  { %913 = dma.done.wait [#allocation3], 128  }
 0x2fa   :  { %914 = vsyncadd [#allocation3], 4294967168 }
 0x2fb   :  { %686 = vsyncpa [#allocation3], 1 }

</bundles_post_ra>
